<compile_context>
chip_gen: v5e
topology: v5e:2x2
jax: 0.10.0
libtpu: 0.0.40
codegen_flags: <defaults>
</compile_context>

<pallas_src>
import jax
import jax.numpy as jnp
from jax.experimental import pallas as pl
from jax.experimental.pallas import tpu as pltpu

_LANE = 128  # TPU lane width; pad the class dim to a multiple of this


def _linear_kernel(x_ref, w_ref, b_ref, o_ref):
    # x_ref: (TB, F) f32, w_ref: (Cpad, F) bf16, b_ref: (1, Cpad) f32,
    # o_ref: (TB, Cpad) f32
    # Cast activations to bf16 for the native MXU path; accumulate in f32.
    x = x_ref[...].astype(jnp.bfloat16)
    acc = jax.lax.dot_general(
        x,
        w_ref[...],
        dimension_numbers=(((1,), (1,)), ((), ())),  # contract F with F, no transpose
        preferred_element_type=jnp.float32,
    )
    o_ref[...] = acc + b_ref[...]


def _pick_batch_tile(B, F, cpad, vmem_budget=20 * 1024 * 1024):
    """Biggest batch tile (multiple of 16 for bf16 sublane packing) whose
    double-buffered working set fits a VMEM budget safe on v5e/v6e/v7x."""
    for tb in (2048, 1024, 512, 256, 128, 64, 32, 16, 8):
        if tb > B:
            continue
        # 2x (input block f32) + 2x (output block f32) + resident weight (bf16) + bias
        work = 2 * tb * F * 4 + 2 * tb * cpad * 4 + cpad * F * 2 + cpad * 4
        if work <= vmem_budget:
            return tb
    return B  # tiny batch (< 8): single block equal to the full dim


def ev_classifier_forward(x, weight, bias):
    """Pallas forward of EV_Classifier.

    x:      (B, n_features) float32
    weight: (n_classes, n_features) float32   (PyTorch nn.Linear convention)
    bias:   (n_classes,) float32
    returns (B, n_classes) float32
    """
    B, F = x.shape
    C = weight.shape[0]
    Cpad = ((C + _LANE - 1) // _LANE) * _LANE

    # Pad params to a lane-dense class dim and cast weight to bf16.
    # (Tiny one-time cost; in production do this once at parameter-init time.)
    w_pad = jnp.zeros((Cpad, F), jnp.bfloat16).at[:C, :].set(
        weight.astype(jnp.bfloat16)
    )
    b_pad = jnp.zeros((1, Cpad), jnp.float32).at[0, :C].set(
        bias.astype(jnp.float32)
    )

    TB = _pick_batch_tile(B, F, Cpad)
    n_blocks = pl.cdiv(B, TB)
    Bp = n_blocks * TB
    x_p = x if Bp == B else jnp.pad(x, ((0, Bp - B), (0, 0)))

    out = pl.pallas_call(
        _linear_kernel,
        out_shape=jax.ShapeDtypeStruct((Bp, Cpad), jnp.float32),
        grid_spec=pltpu.PrefetchScalarGridSpec(
            num_scalar_prefetch=0,
            grid=(n_blocks,),
            in_specs=[
                pl.BlockSpec((TB, F), lambda i: (i, 0)),      # x: tiled over batch
                pl.BlockSpec((Cpad, F), lambda i: (0, 0)),    # weight: VMEM-resident
                pl.BlockSpec((1, Cpad), lambda i: (0, 0)),    # bias: VMEM-resident
            ],
            out_specs=pl.BlockSpec((TB, Cpad), lambda i: (i, 0)),
        ),
        compiler_params=pltpu.CompilerParams(
            dimension_semantics=("parallel",),  # independent batch axis (v7x 2-TC)
        ),
        cost_estimate=pl.CostEstimate(
            flops=2 * Bp * F * Cpad,
            bytes_accessed=4 * Bp * F + 2 * Cpad * F + 4 * Bp * Cpad,
            transcendentals=0,
        ),
    )(x_p, w_pad, b_pad)

    # Slice away batch padding and the lane padding of the class dim.
    return out[:B, :C].astype(x.dtype)


if __name__ == "__main__":
    # Small shapes consistent with the module: n_features=32, n_classes=8, batch=8.
    # TODO(synk): at these tiny shapes the op is launch-overhead bound; the kernel
    # pays off once B (or the number of fused classifier calls) is large.
    B, n_features, n_classes = 8, 32, 8

    key = jax.random.PRNGKey(0)
    kx, kw, kb = jax.random.split(key, 3)

    x = jax.random.normal(kx, (B, n_features), dtype=jnp.float32)

    # Deterministic parameter init (mimics nn.Linear's uniform(-1/sqrt(F), 1/sqrt(F))).
    bound = 1.0 / jnp.sqrt(jnp.float32(n_features))
    weight = jax.random.uniform(
        kw, (n_classes, n_features), minval=-bound, maxval=bound, dtype=jnp.float32
    )
    bias = jax.random.uniform(
        kb, (n_classes,), minval=-bound, maxval=bound, dtype=jnp.float32
    )

    y = ev_classifier_forward(x, weight, bias)
    y = jax.block_until_ready(y)

    # Reference check against plain-JAX f32 linear (tolerance loosened for the
    # bf16 MXU input path; accumulation is f32).
    y_ref = x @ weight.T + bias
    assert y.shape == (B, n_classes)
    assert jnp.allclose(y, y_ref, atol=3e-2, rtol=3e-2), (
        float(jnp.max(jnp.abs(y - y_ref)))
    )

    print("KERNEL_OK")
</pallas_src>

<mosaic_0001>
module attributes {stable_mosaic.version = 11 : i64} {
  func.func @_linear_kernel(%arg0: i32, %arg1: memref<8x32xf32, #tpu.memory_space<vmem>>, %arg2: memref<128x32xbf16, #tpu.memory_space<vmem>>, %arg3: memref<1x128xf32, #tpu.memory_space<vmem>>, %arg4: memref<8x128xf32, #tpu.memory_space<vmem>>) attributes {dimension_semantics = [#tpu.dimension_semantics<parallel>], iteration_bounds = array<i64: 1>, scalar_prefetch = 0 : i64, scratch_operands = 0 : i64, tpu.core_type = #tpu.core_type<tc>, window_params = [{transform_indices = @transform_0, window_bounds = array<i64: 8, 32>}, {pipeline_mode = #tpu.pipeline_mode<synchronous>, transform_indices = @transform_1, window_bounds = array<i64: 128, 32>}, {pipeline_mode = #tpu.pipeline_mode<synchronous>, transform_indices = @transform_2, window_bounds = array<i64: 1, 128>}, {transform_indices = @transform_3, window_bounds = array<i64: 8, 128>}]} {
    %c0 = arith.constant 0 : index
    %c0_0 = arith.constant 0 : index
    %0 = vector.load %arg1[%c0, %c0_0] : memref<8x32xf32, #tpu.memory_space<vmem>>, vector<8x32xf32>
    %1 = arith.truncf %0 : vector<8x32xf32> to vector<8x32xbf16>
    %c0_1 = arith.constant 0 : index
    %c0_2 = arith.constant 0 : index
    %2 = vector.load %arg2[%c0_1, %c0_2] : memref<128x32xbf16, #tpu.memory_space<vmem>>, vector<128x32xbf16>
    %cst = arith.constant dense<0.000000e+00> : vector<8x128xf32>
    %3 = tpu.matmul %1, %2, %cst {dimension_numbers = #tpu.dot_dimension_numbers<[1], [1], [0], [0], [0, 0, 1, 0], [], []>} : vector<8x32xbf16>, vector<128x32xbf16>, vector<8x128xf32> -> vector<8x128xf32>
    %c0_3 = arith.constant 0 : index
    %c0_4 = arith.constant 0 : index
    %4 = vector.load %arg3[%c0_3, %c0_4] : memref<1x128xf32, #tpu.memory_space<vmem>>, vector<1x128xf32>
    %5 = vector.broadcast %4 : vector<1x128xf32> to vector<8x128xf32>
    %6 = arith.addf %3, %5 : vector<8x128xf32>
    %c0_5 = arith.constant 0 : index
    %c0_6 = arith.constant 0 : index
    %7 = vector.load %arg4[%c0_5, %c0_6] : memref<8x128xf32, #tpu.memory_space<vmem>>, vector<8x128xf32>
    tpu.vector_store %arg4[%c0_5, %c0_6], %6 {strides = array<i32>} : memref<8x128xf32, #tpu.memory_space<vmem>>, vector<8x128xf32>,
    return
  }
  func.func @transform_0(%arg0: i32) -> (i32, i32) {
    %c0_i32 = arith.constant 0 : i32
    %c0_i32_0 = arith.constant 0 : i32
    return %arg0, %c0_i32 : i32, i32
  }
  func.func @transform_1(%arg0: i32) -> (i32, i32) {
    %c0_i32 = arith.constant 0 : i32
    %c0_i32_0 = arith.constant 0 : i32
    %c0_i32_1 = arith.constant 0 : i32
    return %c0_i32, %c0_i32_0 : i32, i32
  }
  func.func @transform_2(%arg0: i32) -> (i32, i32) {
    %c0_i32 = arith.constant 0 : i32
    %c0_i32_0 = arith.constant 0 : i32
    %c0_i32_1 = arith.constant 0 : i32
    return %c0_i32, %c0_i32_0 : i32, i32
  }
  func.func @transform_3(%arg0: i32) -> (i32, i32) {
    %c0_i32 = arith.constant 0 : i32
    %c0_i32_0 = arith.constant 0 : i32
    return %arg0, %c0_i32 : i32, i32
  }
}

</mosaic_0001>

<bundles_post_ra>
// kernel: tpu_custom_call.1
= control target key start
LH: loop header
LB: loop body
LE: loop exit
PB: predicated region body
PF: predicated region fallthrough
CT: control target
= control target key end

     0   :  { %vm77_vm0 = vcmask 261120   ;;  %s267_s0 = inlined_call_operand.vmem [shape: f32[8,32], index: 0, kind: input, shape index: {}]   ;;  %s268_s1 = inlined_call_operand.vmem [shape: bf16[128,32], index: 1, kind: input, shape index: {}]   ;;  %s269_s2 = inlined_call_operand.vmem [shape: f32[1,128], index: 2, kind: input, shape index: {}]   ;;  %s270_s3 = inlined_call_operand.hbm [shape: f32[8,128], index: 3, kind: output, shape index: {}]  }
   0x1   :  { %v175_v0 = vld [vmem:[%s268_s1 + $0x38] sm:$0xff] }
   0x2   :  { %v103_v1 = vsel %vm77_vm0, %v175_v0, 0 }
   0x3   :  { %8 = vsyncpa [#allocation3], 0  ;;  %105 = vmatpush.bf16.xpose.msra.mxu0 %v103_v1  ;;  %v174_v2 = vld [vmem:[%s268_s1 + $0x30] sm:$0xff]  ;;  %v173_v4 = vld [vmem:[%s268_s1 + $0x28] sm:$0xff]  ;;  %s204_s5 = smov [#allocation2]  }
   0x4   :  { %v100_v3 = vsel %vm77_vm0, %v174_v2, 0  ;;  %v97_v5 = vsel %vm77_vm0, %v173_v4, 0  ;;  %v172_v6 = vld [vmem:[%s268_s1 + $0x20] sm:$0xff]  ;;  %v171_v8 = vld [vmem:[%s268_s1 + $0x18] sm:$0xff]  ;;  %v170_v10 = vld [vmem:[%s268_s1 + $0x10] sm:$0xff]  ;;  %s124_s6 = sshll.u32 %s204_s5, 4  ;;  %s125_s6 = int_to_ptr.vmem [resolvable:$true] %s124_s6 }
   0x5   :  { %v94_v7 = vsel %vm77_vm0, %v172_v6, 0  ;;  %v91_v9 = vsel %vm77_vm0, %v171_v8, 0  ;;  %v88_v11 = vsel %vm77_vm0, %v170_v10, 0  ;;  %v169_v12 = vld [vmem:[%s268_s1 + $0x8] sm:$0xff]  ;;  %v168_v14 = vld [vmem:[%s268_s1] sm:$0xff]  ;;  %s126_s1 = sshll.u32 %s270_s3, 4  ;;  %s127_s1 = int_to_ptr.hbm [resolvable:$true] %s126_s1 }
   0x6   :  { %v85_v13 = vsel %vm77_vm0, %v169_v12, 0  ;;  %v82_v15 = vsel %vm77_vm0, %v168_v14, 0  ;;  %v15_v16 = vld [vmem:[%s267_s0] sm:$0xff] }
   0x7   :  { %v16_v17 = vpack.c.bf16 %v15_v16, %v15_v16  ;;  %v177_v18 = vld [vmem:[%s269_s2] ss:$0 sm:$0xff] }
   0xb   :  { %106 = vmatpush.bf16.xpose.msra.mxu0 %v100_v3 }
  0x13   :  { %107 = vmatpush.bf16.xpose.msra.mxu0 %v97_v5 }
  0x1b   :  { %108 = vmatpush.bf16.xpose.msra.mxu0 %v94_v7 }
  0x23   :  { %109 = vmatpush.bf16.xpose.msra.mxu0 %v91_v9 }
  0x2b   :  { %110 = vmatpush.bf16.xpose.msra.mxu0 %v88_v11 }
  0x33   :  { %111 = vmatpush.bf16.xpose.msra.mxu0 %v85_v13 }
  0x3b   :  { %112 = vmatpush.bf16.xpose.msra.mxu0 %v82_v15 }
  0x42   :  { %167 = vmatmul.msk.bf16.vlgmr.msra.gmra.mxu0 %vm77_vm0, %v16_v17 }
  0xbf   :  { %v114_v19 = vpop.f32.mrf.mxu0 }
  0xc0   :  { %v115_v20 = vadd.f32 %v177_v18, %v114_v19 }
  0xc2   :  { %118 = vst [vmem:[#allocation2] sm:$0xff] %v115_v20 }
  0xc3   :  { %129 = dma.vmem_to_hbm [thread:$0]  %s125_s6, 128, %s127_s1, [#allocation3]  }
  0xc7   :  { %v116_v21 = vpop.f32.mrf.mxu0 }
  0xc8   :  { %202 = dma.done.wait [#allocation3], 128  }
  0xc9   :  { %203 = vsyncadd [#allocation3], 4294967168 }
  0xca   :  { %134 = vsyncpa [#allocation3], 1 }

</bundles_post_ra>
